<compile_context>
chip_gen: v7x
topology: tpu7x:2x2x1
jax: 0.10.0
libtpu: 0.0.40
codegen_flags: <defaults>
</compile_context>

<pallas_src>
import functools

import jax
import jax.numpy as jnp
from jax.experimental import pallas as pl
from jax.experimental.pallas import tpu as pltpu

_MAX_TILE_B = 512  # batch tile for the grid; 256-1024 is the sweet spot


def _round_up(x, m):
    return ((x + m - 1) // m) * m


# -----------------------------------------------------------------------------
# Parameter packing: 7 (weight, bias) pairs -> one weight slab + one bias slab,
# every layer's output lane-padded to `lane` (= bottleneck_dim) columns and
# every layer's input row-padded to match the (padded) feeding activation.
# -----------------------------------------------------------------------------
def _layer_layout(shape_latent_dim, text_embed_dim, bn, ds_pad, dt_pad):
    # (name, true_in, padded_in_rows, true_out)
    return [
        ("se0", shape_latent_dim, ds_pad, bn),
        ("se1", bn, bn, bn),
        ("pf", text_embed_dim, dt_pad, bn),
        ("p0", 3 * bn, 3 * bn, bn),
        ("p1", bn, bn, bn // 2),
        ("p2", bn // 2, bn, bn // 4),
        ("p3", bn // 4, bn, 1),
    ]


def pack_params(params, shape_latent_dim, text_embed_dim, bn):
    lane = bn
    ds_pad = _round_up(shape_latent_dim, 16)
    dt_pad = _round_up(text_embed_dim, 16)
    layout = _layer_layout(shape_latent_dim, text_embed_dim, bn, ds_pad, dt_pad)

    w_blocks, b_rows, offs = [], [], {}
    row = 0
    for name, tin, pin, tout in layout:
        w = params[name + "_w"]
        b = params[name + "_b"].reshape(1, -1)
        wp = jnp.zeros((pin, lane), jnp.float32).at[:tin, :tout].set(w)
        bp = jnp.zeros((1, lane), jnp.float32).at[:, :tout].set(b)
        w_blocks.append(wp)
        b_rows.append(bp)
        offs[name] = (row, pin)
        row += pin

    # pad bias slab to 8 rows (one full (8,128) sublane tile)
    b_rows.append(jnp.zeros((8 - len(b_rows), lane), jnp.float32))
    w_packed = jnp.concatenate(w_blocks, axis=0)   # (sum(pin), lane) f32
    b_packed = jnp.concatenate(b_rows, axis=0)     # (8, lane) f32
    return w_packed, b_packed, offs, ds_pad, dt_pad


# -----------------------------------------------------------------------------
# Kernel
# -----------------------------------------------------------------------------
def _make_kernel(offs, lane, tile_b, compute_dtype):
    o_se0, r_se0 = offs["se0"]
    o_se1, r_se1 = offs["se1"]
    o_pf, r_pf = offs["pf"]
    o_p0, _ = offs["p0"]
    o_p1, r_p1 = offs["p1"]
    o_p2, r_p2 = offs["p2"]
    o_p3, r_p3 = offs["p3"]

    def kernel(xab_ref, emb_ref, w_ref, b_ref, out_ref):
        # MXU matmul on compute_dtype operands, f32 accumulation.
        def mm(x, row_off, nrows):
            w = w_ref[pl.ds(row_off, nrows), :]            # static, tile-aligned slice
            return jnp.dot(x.astype(compute_dtype), w,
                           preferred_element_type=jnp.float32)

        def bias(i):
            return b_ref[pl.ds(i, 1), :]                   # (1, lane) f32

        # ---- shape encoder: ONE pass over stacked [x_a ; x_b] ---------------
        xab = xab_ref[0]                                   # (2*tile_b, ds_pad)
        h = jnp.maximum(mm(xab, o_se0, r_se0) + bias(0), 0.0)
        enc = mm(h, o_se1, r_se1) + bias(1)                # (2*tile_b, lane) f32
        xa_enc = enc[:tile_b]
        xb_enc = enc[tile_b:]

        # ---- proj_ft ---------------------------------------------------------
        emb_p = mm(emb_ref[...], o_pf, r_pf) + bias(2)     # (tile_b, lane) f32

        # ---- predictor layer 0: concat-free, 3 accumulated partial matmuls --
        acc = mm(xa_enc, o_p0, lane)
        acc = acc + mm(xb_enc, o_p0 + lane, lane)
        acc = acc + mm(emb_p, o_p0 + 2 * lane, lane)
        h = jnp.maximum(acc + bias(3), 0.0)

        # ---- predictor tail: every output lane-padded to `lane` -------------
        h = jnp.maximum(mm(h, o_p1, r_p1) + bias(4), 0.0)
        h = jnp.maximum(mm(h, o_p2, r_p2) + bias(5), 0.0)
        out_ref[...] = mm(h, o_p3, r_p3) + bias(6)         # logit in column 0

    return kernel


# -----------------------------------------------------------------------------
# Wrapper
# -----------------------------------------------------------------------------
def neural_listener_forward(x_a, x_b, embed_ab, params, *,
                            compute_dtype=jnp.float32):
    batch, ds = x_a.shape
    dt = embed_ab.shape[1]
    bn = params["se0_w"].shape[1]
    assert bn % 128 == 0, "bottleneck_dim must be a multiple of 128"
    lane = bn

    w_packed, b_packed, offs, ds_pad, dt_pad = pack_params(params, ds, dt, bn)
    w_packed = w_packed.astype(compute_dtype)      # halves weight DMA in bf16 mode

    # ---- batch padding / tiling ---------------------------------------------
    b_pad = _round_up(max(batch, 8), 8)
    if b_pad > _MAX_TILE_B:
        b_pad = _round_up(b_pad, _MAX_TILE_B)
        tile_b = _MAX_TILE_B
    else:
        tile_b = b_pad
    n_tiles = b_pad // tile_b

    def pad2(x, rows, cols):
        return jnp.pad(x.astype(jnp.float32),
                       ((0, rows - x.shape[0]), (0, cols - x.shape[1])))

    xa = pad2(x_a, b_pad, ds_pad).astype(compute_dtype)
    xb = pad2(x_b, b_pad, ds_pad).astype(compute_dtype)
    em = pad2(embed_ab, b_pad, dt_pad).astype(compute_dtype)

    # (n_tiles, 2*tile_b, ds_pad): per batch-tile, rows = [x_a tile ; x_b tile],
    # so the shape encoder runs once over both shapes (wrapper-side layout
    # plumbing, no in-kernel relayout).
    xab = jnp.concatenate(
        [xa.reshape(n_tiles, tile_b, ds_pad),
         xb.reshape(n_tiles, tile_b, ds_pad)], axis=1)

    kernel = _make_kernel(offs, lane, tile_b, compute_dtype)

    flops = 2 * b_pad * (2 * (ds_pad * lane + lane * lane)
                         + dt_pad * lane + 6 * lane * lane)
    bytes_accessed = (xab.nbytes + em.nbytes + w_packed.nbytes
                      + b_packed.nbytes + b_pad * lane * 4)

    out = pl.pallas_call(
        kernel,
        out_shape=jax.ShapeDtypeStruct((b_pad, lane), jnp.float32),
        grid=(n_tiles,),
        in_specs=[
            pl.BlockSpec((1, 2 * tile_b, ds_pad), lambda i: (i, 0, 0)),
            pl.BlockSpec((tile_b, dt_pad), lambda i: (i, 0)),
            pl.BlockSpec(w_packed.shape, lambda i: (0, 0)),   # weights resident
            pl.BlockSpec(b_packed.shape, lambda i: (0, 0)),   # biases resident
        ],
        out_specs=pl.BlockSpec((tile_b, lane), lambda i: (i, 0)),
        compiler_params=pltpu.CompilerParams(
            dimension_semantics=("parallel",)),
        cost_estimate=pl.CostEstimate(
            flops=flops, transcendentals=0, bytes_accessed=bytes_accessed),
    )(xab, em, w_packed, b_packed)

    return out[:batch, :1]   # column 0 is the real logit; padded lanes are 0


# -----------------------------------------------------------------------------
# Synthetic params + pure-JAX reference
# -----------------------------------------------------------------------------
def init_params(key, shape_latent_dim, text_embed_dim, bottleneck_dim):
    """Deterministic synthetic parameters. Weights stored as (in, out)."""
    bn = bottleneck_dim
    dims = {
        "se0": (shape_latent_dim, bn),
        "se1": (bn, bn),
        "pf": (text_embed_dim, bn),
        "p0": (3 * bn, bn),
        "p1": (bn, bn // 2),
        "p2": (bn // 2, bn // 4),
        "p3": (bn // 4, 1),
    }
    params = {}
    keys = jax.random.split(key, 2 * len(dims))
    for idx, (name, (fin, fout)) in enumerate(dims.items()):
        scale = 1.0 / jnp.sqrt(jnp.float32(fin))
        params[name + "_w"] = (
            jax.random.uniform(keys[2 * idx], (fin, fout), jnp.float32, -1.0, 1.0)
            * scale)
        params[name + "_b"] = (
            jax.random.uniform(keys[2 * idx + 1], (1, fout), jnp.float32, -0.1, 0.1))
    return params


def reference_forward(x_a, x_b, embed_ab, p, compute_dtype=jnp.float32):
    def lin(x, w, b):
        return jnp.dot(x.astype(compute_dtype), w.astype(compute_dtype),
                       preferred_element_type=jnp.float32) + b

    def enc(x):
        h = jnp.maximum(lin(x, p["se0_w"], p["se0_b"]), 0.0)
        return lin(h, p["se1_w"], p["se1_b"])

    xa = enc(x_a)
    xb = enc(x_b)
    em = lin(embed_ab, p["pf_w"], p["pf_b"])
    x = jnp.concatenate([xa, xb, em], axis=1)
    x = jnp.maximum(lin(x, p["p0_w"], p["p0_b"]), 0.0)
    x = jnp.maximum(lin(x, p["p1_w"], p["p1_b"]), 0.0)
    x = jnp.maximum(lin(x, p["p2_w"], p["p2_b"]), 0.0)
    return lin(x, p["p3_w"], p["p3_b"])


if __name__ == "__main__":
    batch = 8
    shape_latent_dim = 32
    text_embed_dim = 48
    bottleneck_dim = 128

    key = jax.random.PRNGKey(0)
    k_xa, k_xb, k_emb, k_params = jax.random.split(key, 4)

    x_a = jax.random.normal(k_xa, (batch, shape_latent_dim), jnp.float32)
    x_b = jax.random.normal(k_xb, (batch, shape_latent_dim), jnp.float32)
    embed_ab = jax.random.normal(k_emb, (batch, text_embed_dim), jnp.float32)
    params = init_params(k_params, shape_latent_dim, text_embed_dim, bottleneck_dim)

    # f32 MXU operands (exact match to the reference)
    out_f32 = jax.block_until_ready(
        neural_listener_forward(x_a, x_b, embed_ab, params,
                                compute_dtype=jnp.float32))
    ref_f32 = reference_forward(x_a, x_b, embed_ab, params, jnp.float32)
    assert out_f32.shape == (batch, 1)
    assert jnp.allclose(out_f32, ref_f32, atol=1e-4, rtol=1e-4)

    # bf16 MXU operands, f32 accumulation (v6e / v7x fast path)
    out_bf16 = jax.block_until_ready(
        neural_listener_forward(x_a, x_b, embed_ab, params,
                                compute_dtype=jnp.bfloat16))
    ref_bf16 = reference_forward(x_a, x_b, embed_ab, params, jnp.bfloat16)
    assert out_bf16.shape == (batch, 1)
    assert jnp.allclose(out_bf16, ref_bf16, atol=5e-2, rtol=5e-2)

    print("KERNEL_OK")
</pallas_src>

<mosaic_0001>
module attributes {stable_mosaic.version = 11 : i64} {
  func.func @kernel(%arg0: i32, %arg1: memref<1x16x32xf32, #tpu.memory_space<vmem>>, %arg2: memref<8x48xf32, #tpu.memory_space<vmem>>, %arg3: memref<976x128xf32, #tpu.memory_space<vmem>>, %arg4: memref<8x128xf32, #tpu.memory_space<vmem>>, %arg5: memref<8x128xf32, #tpu.memory_space<vmem>>) attributes {dimension_semantics = [#tpu.dimension_semantics<parallel>], iteration_bounds = array<i64: 1>, scalar_prefetch = 0 : i64, scratch_operands = 0 : i64, tpu.core_type = #tpu.core_type<tc>, window_params = [{transform_indices = @transform_0, window_bounds = array<i64: 1, 16, 32>}, {transform_indices = @transform_1, window_bounds = array<i64: 8, 48>}, {pipeline_mode = #tpu.pipeline_mode<synchronous>, transform_indices = @transform_2, window_bounds = array<i64: 976, 128>}, {pipeline_mode = #tpu.pipeline_mode<synchronous>, transform_indices = @transform_3, window_bounds = array<i64: 8, 128>}, {transform_indices = @transform_4, window_bounds = array<i64: 8, 128>}]} {
    %c0 = arith.constant 0 : index
    %c0_0 = arith.constant 0 : index
    %c0_1 = arith.constant 0 : index
    %0 = vector.load %arg1[%c0, %c0_0, %c0_1] : memref<1x16x32xf32, #tpu.memory_space<vmem>>, vector<1x16x32xf32>
    %1 = vector.shape_cast %0 : vector<1x16x32xf32> to vector<16x32xf32>
    %c0_2 = arith.constant 0 : index
    %c0_3 = arith.constant 0 : index
    %2 = vector.load %arg3[%c0_2, %c0_3] : memref<976x128xf32, #tpu.memory_space<vmem>>, vector<32x128xf32>
    %cst = arith.constant dense<0.000000e+00> : vector<16x128xf32>
    %3 = tpu.matmul %1, %2, %cst {dimension_numbers = #tpu.dot_dimension_numbers<[1], [0], [0], [1], [0, 0, 1, 1], [], []>} : vector<16x32xf32>, vector<32x128xf32>, vector<16x128xf32> -> vector<16x128xf32>
    %c0_4 = arith.constant 0 : index
    %c0_5 = arith.constant 0 : index
    %4 = vector.load %arg4[%c0_4, %c0_5] : memref<8x128xf32, #tpu.memory_space<vmem>>, vector<1x128xf32>
    %5 = vector.broadcast %4 : vector<1x128xf32> to vector<16x128xf32>
    %6 = arith.addf %3, %5 : vector<16x128xf32>
    %cst_6 = arith.constant 0.000000e+00 : f32
    %7 = vector.broadcast %cst_6 : f32 to vector<16x128xf32>
    %8 = arith.maximumf %6, %7 : vector<16x128xf32>
    %c32 = arith.constant 32 : index
    %c0_7 = arith.constant 0 : index
    %9 = vector.load %arg3[%c32, %c0_7] : memref<976x128xf32, #tpu.memory_space<vmem>>, vector<128x128xf32>
    %cst_8 = arith.constant dense<0.000000e+00> : vector<16x128xf32>
    %10 = tpu.matmul %8, %9, %cst_8 {dimension_numbers = #tpu.dot_dimension_numbers<[1], [0], [0], [1], [0, 0, 1, 1], [], []>} : vector<16x128xf32>, vector<128x128xf32>, vector<16x128xf32> -> vector<16x128xf32>
    %c1 = arith.constant 1 : index
    %c0_9 = arith.constant 0 : index
    %11 = vector.load %arg4[%c1, %c0_9] : memref<8x128xf32, #tpu.memory_space<vmem>>, vector<1x128xf32>
    %12 = vector.broadcast %11 : vector<1x128xf32> to vector<16x128xf32>
    %13 = arith.addf %10, %12 : vector<16x128xf32>
    %14 = vector.extract_strided_slice %13 {offsets = [0, 0], sizes = [8, 128], strides = [1, 1]} : vector<16x128xf32> to vector<8x128xf32>
    %15 = vector.extract_strided_slice %13 {offsets = [8, 0], sizes = [8, 128], strides = [1, 1]} : vector<16x128xf32> to vector<8x128xf32>
    %c0_10 = arith.constant 0 : index
    %c0_11 = arith.constant 0 : index
    %16 = vector.load %arg2[%c0_10, %c0_11] : memref<8x48xf32, #tpu.memory_space<vmem>>, vector<8x48xf32>
    %c160 = arith.constant 160 : index
    %c0_12 = arith.constant 0 : index
    %17 = vector.load %arg3[%c160, %c0_12] : memref<976x128xf32, #tpu.memory_space<vmem>>, vector<48x128xf32>
    %cst_13 = arith.constant dense<0.000000e+00> : vector<8x128xf32>
    %18 = tpu.matmul %16, %17, %cst_13 {dimension_numbers = #tpu.dot_dimension_numbers<[1], [0], [0], [1], [0, 0, 1, 1], [], []>} : vector<8x48xf32>, vector<48x128xf32>, vector<8x128xf32> -> vector<8x128xf32>
    %c2 = arith.constant 2 : index
    %c0_14 = arith.constant 0 : index
    %19 = vector.load %arg4[%c2, %c0_14] : memref<8x128xf32, #tpu.memory_space<vmem>>, vector<1x128xf32>
    %20 = vector.broadcast %19 : vector<1x128xf32> to vector<8x128xf32>
    %21 = arith.addf %18, %20 : vector<8x128xf32>
    %c208 = arith.constant 208 : index
    %c0_15 = arith.constant 0 : index
    %22 = vector.load %arg3[%c208, %c0_15] : memref<976x128xf32, #tpu.memory_space<vmem>>, vector<128x128xf32>
    %cst_16 = arith.constant dense<0.000000e+00> : vector<8x128xf32>
    %23 = tpu.matmul %14, %22, %cst_16 {dimension_numbers = #tpu.dot_dimension_numbers<[1], [0], [0], [1], [0, 0, 1, 1], [], []>} : vector<8x128xf32>, vector<128x128xf32>, vector<8x128xf32> -> vector<8x128xf32>
    %c336 = arith.constant 336 : index
    %c0_17 = arith.constant 0 : index
    %24 = vector.load %arg3[%c336, %c0_17] : memref<976x128xf32, #tpu.memory_space<vmem>>, vector<128x128xf32>
    %cst_18 = arith.constant dense<0.000000e+00> : vector<8x128xf32>
    %25 = tpu.matmul %15, %24, %cst_18 {dimension_numbers = #tpu.dot_dimension_numbers<[1], [0], [0], [1], [0, 0, 1, 1], [], []>} : vector<8x128xf32>, vector<128x128xf32>, vector<8x128xf32> -> vector<8x128xf32>
    %26 = arith.addf %23, %25 : vector<8x128xf32>
    %c464 = arith.constant 464 : index
    %c0_19 = arith.constant 0 : index
    %27 = vector.load %arg3[%c464, %c0_19] : memref<976x128xf32, #tpu.memory_space<vmem>>, vector<128x128xf32>
    %cst_20 = arith.constant dense<0.000000e+00> : vector<8x128xf32>
    %28 = tpu.matmul %21, %27, %cst_20 {dimension_numbers = #tpu.dot_dimension_numbers<[1], [0], [0], [1], [0, 0, 1, 1], [], []>} : vector<8x128xf32>, vector<128x128xf32>, vector<8x128xf32> -> vector<8x128xf32>
    %29 = arith.addf %26, %28 : vector<8x128xf32>
    %c3 = arith.constant 3 : index
    %c0_21 = arith.constant 0 : index
    %30 = vector.load %arg4[%c3, %c0_21] : memref<8x128xf32, #tpu.memory_space<vmem>>, vector<1x128xf32>
    %31 = vector.broadcast %30 : vector<1x128xf32> to vector<8x128xf32>
    %32 = arith.addf %29, %31 : vector<8x128xf32>
    %cst_22 = arith.constant 0.000000e+00 : f32
    %33 = vector.broadcast %cst_22 : f32 to vector<8x128xf32>
    %34 = arith.maximumf %32, %33 : vector<8x128xf32>
    %c592 = arith.constant 592 : index
    %c0_23 = arith.constant 0 : index
    %35 = vector.load %arg3[%c592, %c0_23] : memref<976x128xf32, #tpu.memory_space<vmem>>, vector<128x128xf32>
    %cst_24 = arith.constant dense<0.000000e+00> : vector<8x128xf32>
    %36 = tpu.matmul %34, %35, %cst_24 {dimension_numbers = #tpu.dot_dimension_numbers<[1], [0], [0], [1], [0, 0, 1, 1], [], []>} : vector<8x128xf32>, vector<128x128xf32>, vector<8x128xf32> -> vector<8x128xf32>
    %c4 = arith.constant 4 : index
    %c0_25 = arith.constant 0 : index
    %37 = vector.load %arg4[%c4, %c0_25] : memref<8x128xf32, #tpu.memory_space<vmem>>, vector<1x128xf32>
    %38 = vector.broadcast %37 : vector<1x128xf32> to vector<8x128xf32>
    %39 = arith.addf %36, %38 : vector<8x128xf32>
    %cst_26 = arith.constant 0.000000e+00 : f32
    %40 = vector.broadcast %cst_26 : f32 to vector<8x128xf32>
    %41 = arith.maximumf %39, %40 : vector<8x128xf32>
    %c720 = arith.constant 720 : index
    %c0_27 = arith.constant 0 : index
    %42 = vector.load %arg3[%c720, %c0_27] : memref<976x128xf32, #tpu.memory_space<vmem>>, vector<128x128xf32>
    %cst_28 = arith.constant dense<0.000000e+00> : vector<8x128xf32>
    %43 = tpu.matmul %41, %42, %cst_28 {dimension_numbers = #tpu.dot_dimension_numbers<[1], [0], [0], [1], [0, 0, 1, 1], [], []>} : vector<8x128xf32>, vector<128x128xf32>, vector<8x128xf32> -> vector<8x128xf32>
    %c5 = arith.constant 5 : index
    %c0_29 = arith.constant 0 : index
    %44 = vector.load %arg4[%c5, %c0_29] : memref<8x128xf32, #tpu.memory_space<vmem>>, vector<1x128xf32>
    %45 = vector.broadcast %44 : vector<1x128xf32> to vector<8x128xf32>
    %46 = arith.addf %43, %45 : vector<8x128xf32>
    %cst_30 = arith.constant 0.000000e+00 : f32
    %47 = vector.broadcast %cst_30 : f32 to vector<8x128xf32>
    %48 = arith.maximumf %46, %47 : vector<8x128xf32>
    %c848 = arith.constant 848 : index
    %c0_31 = arith.constant 0 : index
    %49 = vector.load %arg3[%c848, %c0_31] : memref<976x128xf32, #tpu.memory_space<vmem>>, vector<128x128xf32>
    %cst_32 = arith.constant dense<0.000000e+00> : vector<8x128xf32>
    %50 = tpu.matmul %48, %49, %cst_32 {dimension_numbers = #tpu.dot_dimension_numbers<[1], [0], [0], [1], [0, 0, 1, 1], [], []>} : vector<8x128xf32>, vector<128x128xf32>, vector<8x128xf32> -> vector<8x128xf32>
    %c6 = arith.constant 6 : index
    %c0_33 = arith.constant 0 : index
    %51 = vector.load %arg4[%c6, %c0_33] : memref<8x128xf32, #tpu.memory_space<vmem>>, vector<1x128xf32>
    %52 = vector.broadcast %51 : vector<1x128xf32> to vector<8x128xf32>
    %53 = arith.addf %50, %52 : vector<8x128xf32>
    %c0_34 = arith.constant 0 : index
    %c0_35 = arith.constant 0 : index
    %54 = vector.load %arg5[%c0_34, %c0_35] : memref<8x128xf32, #tpu.memory_space<vmem>>, vector<8x128xf32>
    tpu.vector_store %arg5[%c0_34, %c0_35], %53 {strides = array<i32>} : memref<8x128xf32, #tpu.memory_space<vmem>>, vector<8x128xf32>,
    return
  }
  func.func @transform_0(%arg0: i32) -> (i32, i32, i32) {
    %c0_i32 = arith.constant 0 : i32
    %c0_i32_0 = arith.constant 0 : i32
    %c0_i32_1 = arith.constant 0 : i32
    return %arg0, %c0_i32, %c0_i32_0 : i32, i32, i32
  }
  func.func @transform_1(%arg0: i32) -> (i32, i32) {
    %c0_i32 = arith.constant 0 : i32
    %c0_i32_0 = arith.constant 0 : i32
    return %arg0, %c0_i32 : i32, i32
  }
  func.func @transform_2(%arg0: i32) -> (i32, i32) {
    %c0_i32 = arith.constant 0 : i32
    %c0_i32_0 = arith.constant 0 : i32
    %c0_i32_1 = arith.constant 0 : i32
    return %c0_i32, %c0_i32_0 : i32, i32
  }
  func.func @transform_3(%arg0: i32) -> (i32, i32) {
    %c0_i32 = arith.constant 0 : i32
    %c0_i32_0 = arith.constant 0 : i32
    %c0_i32_1 = arith.constant 0 : i32
    return %c0_i32, %c0_i32_0 : i32, i32
  }
  func.func @transform_4(%arg0: i32) -> (i32, i32) {
    %c0_i32 = arith.constant 0 : i32
    %c0_i32_0 = arith.constant 0 : i32
    return %arg0, %c0_i32 : i32, i32
  }
}

</mosaic_0001>

<bundles_post_ra>
// kernel: tpu_custom_call.1
= control target key start
LH: loop header
LB: loop body
LE: loop exit
PB: predicated region body
PF: predicated region fallthrough
CT: control target
= control target key end

     0   :  { %9 = vsyncpa [#allocation3], 0  ;;  %s1779_s0 = inlined_call_operand.hbm [shape: f32[1,16,32], index: 0, kind: input, shape index: {}]   ;;  %s1780_s1 = inlined_call_operand.hbm [shape: f32[8,48], index: 1, kind: input, shape index: {}]   ;;  %s1781_s2 = inlined_call_operand.hbm [shape: f32[976,128], index: 2, kind: input, shape index: {}]   ;;  %s1782_s3 = inlined_call_operand.vmem [shape: f32[8,128], index: 3, kind: input, shape index: {}]   ;;  %s1783_s4 = inlined_call_operand.hbm [shape: f32[8,128], index: 4, kind: output, shape index: {}]  }
   0x1   :  { %10 = vsyncpa [#allocation6], 0 }
   0x2   :  { %11 = vsyncpa [#allocation4], 0  ;;  %s1602_s15 = smov [#allocation5]   ;;  %s1603_s17 = smov [#allocation2]  }
   0x3   :  { %s30_s16 = sshll.u32 %s1602_s15, 4  ;;  %s17_s18 = sshll.u32 %s1603_s17, 4  ;;  %s31_s16 = int_to_ptr.vmem [resolvable:$true] %s30_s16  ;;  %s1636_s18 = int_to_ptr.vmem [resolvable:$true] %s17_s18 }
   0x4   :  { %s1508_s21 = scalar_lea.hbm %s1780_s1, 128 }
   0x5   :  { %p1509_p0 = scmp.ne.s32.totalorder %s1780_s1, %s1508_s21  ;;  %p1512_p1 = scmp.lt.u32.totalorder %s1508_s21, %s1780_s1 }
   0x7   :  { %p1514_p2 = pnand %p1512_p1, %p1509_p0 }
   0x9   :  { %1517 = shalt.err (!%p1514_p2)
}
   0xa   :  { %s1518_s26 = scalar_lea.vmem %s31_s16, 128  ;;  %p1523_p4 = scmp.lt.s32.totalorder %s31_s16, %s31_s16 }
   0xb   :  { %p1519_p3 = scmp.ne.s32.totalorder %s31_s16, %s1518_s26  ;;  %p1524_p5 = scmp.lt.s32.totalorder %s1518_s26, %s1518_s26 }
   0xd   :  { %p1525_p6 = por %p1524_p5, %p1523_p4 }
   0xf   :  { %p1526_p7 = pnand %p1525_p6, %p1519_p3 }
  0x11   :  { %1529 = shalt.err (!%p1526_p7)
}
  0x12   :  { %33 = dma.hbm_to_vmem [thread:$0]  %s1780_s1, 128, %s31_s16, [#allocation6]  }
  0x13   :  { %s1530_s5 = scalar_lea.hbm %s1779_s0, 256 }
  0x14   :  { %p1531_p8 = scmp.ne.s32.totalorder %s1779_s0, %s1530_s5  ;;  %p1534_p9 = scmp.lt.u32.totalorder %s1530_s5, %s1779_s0 }
  0x16   :  { %p1536_p10 = pnand %p1534_p9, %p1531_p8 }
  0x18   :  { %1539 = shalt.err (!%p1536_p10)
}
  0x19   :  { %s1540_s10 = scalar_lea.vmem %s1636_s18, 256  ;;  %p1545_p12 = scmp.lt.s32.totalorder %s1636_s18, %s1636_s18 }
  0x1a   :  { %p1541_p11 = scmp.ne.s32.totalorder %s1636_s18, %s1540_s10  ;;  %p1546_p13 = scmp.lt.s32.totalorder %s1540_s10, %s1540_s10 }
  0x1c   :  { %p1547_p0 = por %p1546_p13, %p1545_p12 }
  0x1e   :  { %p1548_p1 = pnand %p1547_p0, %p1541_p11 }
  0x20   :  { %1551 = shalt.err (!%p1548_p1)
}
  0x21   :  { %s1604_s1 = smov 128   ;;  %s1605_s11 = smov 8  }
  0x22   :  { %23 = dma.hbm_to_vmem [thread:$0]  %s1779_s0, 256, %s1636_s18, [#allocation3], %s1604_s1, %s1604_s1, %s1605_s11  }
  0x23   :  { %s1606_s14 = smov [#allocation7]   ;;  %s1552_s19 = scalar_lea.hbm %s1781_s2, 15616 }
  0x24   :  { %s39_s15 = sshll.u32 %s1606_s14, 4  ;;  %p1553_p2 = scmp.ne.s32.totalorder %s1781_s2, %s1552_s19  ;;  %s40_s15 = int_to_ptr.vmem [resolvable:$true] %s39_s15 }
  0x25   :  { %p1556_p3 = scmp.lt.u32.totalorder %s1552_s19, %s1781_s2 }
  0x27   :  { %p1558_p4 = pnand %p1556_p3, %p1553_p2 }
  0x29   :  { %1561 = shalt.err (!%p1558_p4)
}
  0x2a   :  { %s1562_s24 = scalar_lea.vmem %s40_s15, 15616  ;;  %p1567_p6 = scmp.lt.s32.totalorder %s40_s15, %s40_s15 }
  0x2b   :  { %p1563_p5 = scmp.ne.s32.totalorder %s40_s15, %s1562_s24  ;;  %p1568_p7 = scmp.lt.s32.totalorder %s1562_s24, %s1562_s24 }
  0x2d   :  { %p1569_p8 = por %p1568_p7, %p1567_p6 }
  0x2f   :  { %p1570_p9 = pnand %p1569_p8, %p1563_p5 }
  0x31   :  { %1573 = shalt.err (!%p1570_p9)
}
  0x32   :  { %45 = dma.hbm_to_vmem [thread:$0]  %s1781_s2, 15616, %s40_s15, [#allocation6], %s1604_s1, %s1604_s1, %s1605_s11  }
  0x33   :  { %1596 = dma.done.wait [#allocation3], 256  }
  0x34   :  { %1597 = vsyncadd [#allocation3], 4294967040 }
  0x35   :  { %1598 = dma.done.wait [#allocation6], 15744  }
  0x36   :  { %1599 = vsyncadd [#allocation6], 4294951552  ;;  %vm68_vm0 = vcmask 261120   ;;  %v59_v0 = vld [vmem:[#allocation7] sm:$0xff]  ;;  %v60_v1 = vld [vmem:[#allocation7 + $0x8] sm:$0xff]  ;;  %v1607_v35 = vmov 0.0|0.0  }
  0x37   :  { %v61_v2 = vld [vmem:[#allocation7 + $0x10] sm:$0xff]  ;;  %v1306_v3 = vpack.c.bf16 %v60_v1, %v59_v0  ;;  %v62_v4 = vld [vmem:[#allocation7 + $0x18] sm:$0xff]  ;;  %v57_v5 = vld [vmem:[#allocation2] sm:$0xff]  ;;  %vm1608_vm1 = vmmov 0   ;;  %v1609_v38 = vmov 0.0   ;;  %vm260_vm2 = vcmask 392192  }
  0x38   :  { %v1310_v6 = vpack.c.bf16 %v62_v4, %v61_v2  ;;  %1043 = vmatprep.mubr.msk.f32.mxu0 %vm68_vm0, %v57_v5  ;;  %v152_v7 = vld [vmem:[#allocation7 + $0x20] sm:$0xff]  ;;  %v153_v8 = vld [vmem:[#allocation7 + $0x28] sm:$0xff]  ;;  %v154_v9 = vld [vmem:[#allocation7 + $0x30] sm:$0xff]  ;;  %s1610_s11 = smov [#allocation8]  }
  0x39   :  { %1307 = vmatprep.subr.bf16.mxu0 %v1306_v3  ;;  %v1314_v10 = vpack.c.bf16 %v153_v8, %v152_v7  ;;  %v155_v11 = vld [vmem:[#allocation7 + $0x38] sm:$0xff]  ;;  %v156_v13 = vld [vmem:[#allocation7 + $0x40] sm:$0xff]  ;;  %v157_v14 = vld [vmem:[#allocation7 + $0x48] sm:$0xff]  ;;  %s882_s12 = sshll.u32 %s1610_s11, 4  ;;  %s883_s12 = int_to_ptr.vmem [resolvable:$true] %s882_s12 }
  0x3a   :  { %1309 = vmatpush3.bf16.msra.mxu0 %v1306_v3  ;;  %v1318_v12 = vpack.c.bf16 %v155_v11, %v154_v9  ;;  %v1322_v15 = vpack.c.bf16 %v157_v14, %v156_v13  ;;  %v58_v16 = vld [vmem:[#allocation2 + $0x8] sm:$0xff]  ;;  %v159_v18 = vld [vmem:[#allocation7 + $0x58] sm:$0xff]  ;;  %v160_v20 = vld [vmem:[#allocation7 + $0x60] sm:$0xff]  ;;  %s1574_s13 = scalar_lea.vmem %s883_s12, 128  ;;  %p1579_p11 = scmp.lt.s32.totalorder %s883_s12, %s883_s12 }
  0x3b   :  { %1311 = vmatprep.subr.bf16.mxu0 %v1310_v6  ;;  %1315 = vmatprep.subr.bf16.mxu1 %v1314_v10  ;;  %v158_v17 = vld [vmem:[#allocation7 + $0x50] sm:$0xff]  ;;  %v161_v21 = vld [vmem:[#allocation7 + $0x68] sm:$0xff]  ;;  %v163_v24 = vld [vmem:[#allocation7 + $0x78] sm:$0xff]  ;;  %p1575_p10 = scmp.ne.s32.totalorder %s883_s12, %s1574_s13  ;;  %p1580_p12 = scmp.lt.s32.totalorder %s1574_s13, %s1574_s13 }
  0x3c   :  { %1317 = vmatpush3.bf16.msra.mxu1 %v1314_v10  ;;  %v1326_v19 = vpack.c.bf16 %v159_v18, %v158_v17  ;;  %v1330_v22 = vpack.c.bf16 %v161_v21, %v160_v20  ;;  %v162_v23 = vld [vmem:[#allocation7 + $0x70] sm:$0xff]  ;;  %v164_v26 = vld [vmem:[#allocation7 + $0x80] sm:$0xff]  ;;  %v165_v27 = vld [vmem:[#allocation7 + $0x88] sm:$0xff] }
  0x3d   :  { %1319 = vmatprep.subr.bf16.mxu1 %v1318_v12  ;;  %v1334_v25 = vpack.c.bf16 %v163_v24, %v162_v23  ;;  %v1338_v28 = vpack.c.bf16 %v165_v27, %v164_v26  ;;  %v166_v29 = vld [vmem:[#allocation7 + $0x90] sm:$0xff]  ;;  %v167_v30 = vld [vmem:[#allocation7 + $0x98] sm:$0xff]  ;;  %v249_v32 = vld [vmem:[#allocation7 + $0xa0] sm:$0xff]  ;;  %p1581_p13 = por %p1580_p12, %p1579_p11 }
  0x3e   :  { %1313 = vmatpush3.bf16.msra.mxu0 %v1310_v6  ;;  %v1342_v31 = vpack.c.bf16 %v167_v30, %v166_v29  ;;  %v250_v33 = vld [vmem:[#allocation7 + $0xa8] sm:$0xff]  ;;  %v251_v34 = vld [vmem:[#allocation7 + $0xb0] sm:$0xff]  ;;  %v252_v37 = vld [vmem:[#allocation7 + $0xb8] sm:$0xff] }
  0x3f   :  { %1346 = vmatprep.subr.bf16.mxu0 %v1607_v35  ;;  %v1347_v36 = vpack.c.bf16 %v250_v33, %v249_v32  ;;  %v1350_v39 = vpack.c.bf16 %v252_v37, %v251_v34  ;;  %v253_v40 = vld [vmem:[#allocation7 + $0xc0] sm:$0xff]  ;;  %v254_v41 = vld [vmem:[#allocation7 + $0xc8] sm:$0xff]  ;;  %v350_v43 = vld [vmem:[#allocation7 + $0x150] sm:$0xff]  ;;  %p1582_p0 = pnand %p1581_p13, %p1575_p10 }
  0x40   :  { %1321 = vmatpush3.bf16.msra.mxu1 %v1318_v12  ;;  %v1353_v42 = vpack.c.bf16 %v254_v41, %v253_v40  ;;  %v351_v44 = vld [vmem:[#allocation7 + $0x158] sm:$0xff]  ;;  %v352_v47 = vld [vmem:[#allocation7 + $0x160] sm:$0xff]  ;;  %v353_v48 = vld [vmem:[#allocation7 + $0x168] sm:$0xff] }
  0x41   :  { %1044 = vmatmul.mubr.msk.f32.vlgmr.msra.gmra.mrb[0].mxu0 %vm68_vm0, %v58_v16  ;;  %1323 = vmatprep.subr.bf16.mxu1 %v1322_v15  ;;  %v248_v45 = vld [vmem:[#allocation5] sm:$0xff]  ;;  %v1356_v46 = vpack.c.bf16 %v351_v44, %v350_v43  ;;  %v1359_v49 = vpack.c.bf16 %v353_v48, %v352_v47  ;;  %v354_v50 = vld [vmem:[#allocation7 + $0x170] sm:$0xff]  ;;  %v356_v53 = vld [vmem:[#allocation7 + $0x180] sm:$0xff] }
  0x42   :  { %1093 = vmatprep.mubr.msk.f32.mxu0 %vm1608_vm1, %v1609_v38  ;;  %1348 = vmatpush3.bf16.msra.mxu0 %v1347_v36  ;;  %v355_v51 = vld [vmem:[#allocation7 + $0x178] sm:$0xff]  ;;  %v357_v54 = vld [vmem:[#allocation7 + $0x188] sm:$0xff]  ;;  %v358_v56 = vld [vmem:[#allocation7 + $0x190] sm:$0xff] }
  0x43   :  { %1349 = vmatprep.subr.bf16.mxu0 %v1607_v35  ;;  %v1362_v52 = vpack.c.bf16 %v355_v51, %v354_v50  ;;  %v1365_v55 = vpack.c.bf16 %v357_v54, %v356_v53  ;;  %v359_v57 = vld [vmem:[#allocation7 + $0x198] sm:$0xff]  ;;  %v360_v59 = vld [vmem:[#allocation7 + $0x1a0] sm:$0xff]  ;;  %v361_v60 = vld [vmem:[#allocation7 + $0x1a8] sm:$0xff] }
  0x44   :  { %1325 = vmatpush3.bf16.msra.mxu1 %v1322_v15  ;;  %v1368_v58 = vpack.c.bf16 %v359_v57, %v358_v56  ;;  %v1371_v61 = vpack.c.bf16 %v361_v60, %v360_v59  ;;  %v362_v62 = vld [vmem:[#allocation7 + $0x1b0] sm:$0xff]  ;;  %v363_v63 = vld [vmem:[#allocation7 + $0x1b8] sm:$0xff]  ;;  %v364_v1 = vld [vmem:[#allocation7 + $0x1c0] sm:$0xff] }
  0x45   :  { %1327 = vmatprep.subr.bf16.mxu1 %v1326_v19  ;;  %v1374_v0 = vpack.c.bf16 %v363_v63, %v362_v62  ;;  %v365_v2 = vld [vmem:[#allocation7 + $0x1c8] sm:$0xff]  ;;  %v334_v8 = vld [vmem:[#allocation7 + $0xd0] sm:$0xff]  ;;  %v335_v9 = vld [vmem:[#allocation7 + $0xd8] sm:$0xff] }
  0x46   :  { %1351 = vmatpush3.bf16.msra.mxu0 %v1350_v39  ;;  %v1377_v3 = vpack.c.bf16 %v365_v2, %v364_v1  ;;  %v892_v4 = vld [vmem:[%s1782_s3] ss:$0 sm:$0xff]  ;;  %v1380_v12 = vpack.c.bf16 %v335_v9, %v334_v8  ;;  %v336_v14 = vld [vmem:[#allocation7 + $0xe0] sm:$0xff]  ;;  %v338_v17 = vld [vmem:[#allocation7 + $0xf0] sm:$0xff] }
  0x47   :  { %1352 = vmatprep.subr.bf16.mxu0 %v1607_v35  ;;  %v337_v15 = vld [vmem:[#allocation7 + $0xe8] sm:$0xff]  ;;  %v339_v18 = vld [vmem:[#allocation7 + $0xf8] sm:$0xff]  ;;  %v340_v20 = vld [vmem:[#allocation7 + $0x100] sm:$0xff] }
  0x48   :  { %1329 = vmatpush3.bf16.msra.mxu1 %v1326_v19  ;;  %v1383_v16 = vpack.c.bf16 %v337_v15, %v336_v14  ;;  %v1386_v19 = vpack.c.bf16 %v339_v18, %v338_v17  ;;  %v341_v21 = vld [vmem:[#allocation7 + $0x108] sm:$0xff]  ;;  %v342_v23 = vld [vmem:[#allocation7 + $0x110] sm:$0xff]  ;;  %v343_v24 = vld [vmem:[#allocation7 + $0x118] sm:$0xff] }
  0x49   :  { %1331 = vmatprep.subr.bf16.mxu1 %v1330_v22  ;;  %v344_v26 = vld [vmem:[#allocation7 + $0x120] sm:$0xff]  ;;  %v345_v27 = vld [vmem:[#allocation7 + $0x128] sm:$0xff]  ;;  %v346_v29 = vld [vmem:[#allocation7 + $0x130] sm:$0xff] }
  0x4a   :  { %1354 = vmatpush3.bf16.msra.mxu0 %v1353_v42  ;;  %v347_v30 = vld [vmem:[#allocation7 + $0x138] sm:$0xff]  ;;  %v348_v32 = vld [vmem:[#allocation7 + $0x140] sm:$0xff]  ;;  %v349_v33 = vld [vmem:[#allocation7 + $0x148] sm:$0xff] }
  0x4b   :  { %1355 = vmatprep.subr.bf16.mxu0 %v1607_v35  ;;  %v1401_v34 = vpack.c.bf16 %v349_v33, %v348_v32  ;;  %v506_v39 = vld [vmem:[#allocation7 + $0x1d0] sm:$0xff]  ;;  %v507_v40 = vld [vmem:[#allocation7 + $0x1d8] sm:$0xff]  ;;  %v895_v41 = vld [vmem:[%s1782_s3 + $0x1] ss:$0 sm:$0xff] }
  0x4c   :  { %1333 = vmatpush3.bf16.msra.mxu1 %v1330_v22  ;;  %v1389_v22 = vpack.c.bf16 %v341_v21, %v340_v20  ;;  %v1404_v43 = vpack.c.bf16 %v507_v40, %v506_v39  ;;  %v509_v47 = vld [vmem:[#allocation7 + $0x1e8] sm:$0xff]  ;;  %v510_v50 = vld [vmem:[#allocation7 + $0x1f0] sm:$0xff]  ;;  %v511_v51 = vld [vmem:[#allocation7 + $0x1f8] sm:$0xff] }
  0x4d   :  { %1335 = vmatprep.subr.bf16.mxu1 %v1334_v25  ;;  %1094 = vmatmul.mubr.msk.f32.vlgmr.msra.gmra.mrb[2].mxu0 %vm260_vm2, %v248_v45  ;;  %v512_v53 = vld [vmem:[#allocation7 + $0x200] sm:$0xff]  ;;  %v513_v54 = vld [vmem:[#allocation7 + $0x208] sm:$0xff]  ;;  %v514_v56 = vld [vmem:[#allocation7 + $0x210] sm:$0xff] }
  0x4e   :  { %1357 = vmatpush3.bf16.msra.mxu0 %v1356_v46  ;;  %1128 = vmatprep.mubr.msk.f32.mxu0 %vm1608_vm1, %v1609_v38  ;;  %v508_v46 = vld [vmem:[#allocation7 + $0x1e0] sm:$0xff]  ;;  %v515_v57 = vld [vmem:[#allocation7 + $0x218] sm:$0xff]  ;;  %v517_v60 = vld [vmem:[#allocation7 + $0x228] sm:$0xff] }
  0x4f   :  { %1358 = vmatprep.subr.bf16.mxu0 %v1607_v35  ;;  %v516_v59 = vld [vmem:[#allocation7 + $0x220] sm:$0xff]  ;;  %v518_v62 = vld [vmem:[#allocation7 + $0x230] sm:$0xff]  ;;  %v519_v63 = vld [vmem:[#allocation7 + $0x238] sm:$0xff] }
  0x50   :  { %1337 = vmatpush3.bf16.msra.mxu1 %v1334_v25  ;;  %v1392_v25 = vpack.c.bf16 %v343_v24, %v342_v23  ;;  %v520_v1 = vld [vmem:[#allocation7 + $0x240] sm:$0xff]  ;;  %v521_v2 = vld [vmem:[#allocation7 + $0x248] sm:$0xff]  ;;  %v608_v18 = vld [vmem:[#allocation7 + $0x290] sm:$0xff] }
  0x51   :  { %1339 = vmatprep.subr.bf16.mxu1 %v1338_v28  ;;  %v602_v8 = vld [vmem:[#allocation7 + $0x260] sm:$0xff]  ;;  %v612_v24 = vld [vmem:[#allocation7 + $0x2b0] sm:$0xff]  ;;  %v697_v39 = vld [vmem:[#allocation7 + $0x2f8] sm:$0xff] }
  0x52   :  { %1360 = vmatpush3.bf16.msra.mxu0 %v1359_v49  ;;  %v1407_v49 = vpack.c.bf16 %v509_v47, %v508_v46  ;;  %v606_v15 = vld [vmem:[#allocation7 + $0x280] sm:$0xff] }
  0x53   :  { %1361 = vmatprep.subr.bf16.mxu0 %v1607_v35  ;;  %v610_v21 = vld [vmem:[#allocation7 + $0x2a0] sm:$0xff] }
  0x54   :  { %1341 = vmatpush3.bf16.msra.mxu1 %v1338_v28  ;;  %v1395_v28 = vpack.c.bf16 %v345_v27, %v344_v26  ;;  %v614_v27 = vld [vmem:[#allocation7 + $0x2c0] sm:$0xff] }
  0x55   :  { %1343 = vmatprep.subr.bf16.mxu1 %v1342_v31  ;;  %v694_v32 = vld [vmem:[#allocation7 + $0x2e0] sm:$0xff] }
  0x56   :  { %1363 = vmatpush3.bf16.msra.mxu0 %v1362_v52  ;;  %v1410_v52 = vpack.c.bf16 %v511_v51, %v510_v50  ;;  %v702_v47 = vld [vmem:[#allocation7 + $0x320] sm:$0xff]  ;;  %v704_v50 = vld [vmem:[#allocation7 + $0x330] sm:$0xff]  ;;  %v705_v51 = vld [vmem:[#allocation7 + $0x338] sm:$0xff] }
  0x57   :  { %1364 = vmatprep.subr.bf16.mxu0 %v1607_v35 }
  0x58   :  { %1345 = vmatpush3.bf16.msra.mxu1 %v1342_v31  ;;  %v1398_v31 = vpack.c.bf16 %v347_v30, %v346_v29  ;;  %v692_v30 = vld [vmem:[#allocation7 + $0x2d0] sm:$0xff] }
  0x59   :  { %1379 = vmatprep.subr.bf16.mxu1 %v1607_v35 }
  0x5a   :  { %1366 = vmatpush3.bf16.msra.mxu0 %v1365_v55  ;;  %v1413_v55 = vpack.c.bf16 %v513_v54, %v512_v53 }
  0x5b   :  { %1367 = vmatprep.subr.bf16.mxu0 %v1607_v35 }
  0x5e   :  { %1369 = vmatpush3.bf16.msra.mxu0 %v1368_v58  ;;  %v1416_v58 = vpack.c.bf16 %v515_v57, %v514_v56 }
  0x5f   :  { %1370 = vmatprep.subr.bf16.mxu0 %v1607_v35 }
  0x62   :  { %1372 = vmatpush3.bf16.msra.mxu0 %v1371_v61  ;;  %v1419_v61 = vpack.c.bf16 %v517_v60, %v516_v59  ;;  %v898_v59 = vld [vmem:[%s1782_s3 + $0x3] ss:$0 sm:$0xff] }
  0x63   :  { %1373 = vmatprep.subr.bf16.mxu0 %v1607_v35 }
  0x66   :  { %1375 = vmatpush3.bf16.msra.mxu0 %v1374_v0  ;;  %v1422_v0 = vpack.c.bf16 %v519_v63, %v518_v62 }
  0x67   :  { %1376 = vmatprep.subr.bf16.mxu0 %v1607_v35 }
  0x6a   :  { %1378 = vmatpush3.bf16.msra.mxu0 %v1377_v3  ;;  %v896_v3 = vld [vmem:[%s1782_s3 + $0x2] ss:$0 sm:$0xff] }
  0x6b   :  { %1403 = vmatprep.subr.bf16.mxu0 %v1607_v35 }
 0x114   :  { %v1045_v5 = vpop.f32.mrb[0].mxu0 }
 0x115   :  { %v147_v6 = vadd.f32 %v1045_v5, %v892_v4  ;;  %v141_v7 = vpop.f32.mrb[1].mxu0 }
 0x116   :  { %v142_v10 = vadd.f32 %v892_v4, %v141_v7  ;;  %v1425_v4 = vpack.c.bf16 %v521_v2, %v520_v1  ;;  %v601_v7 = vld [vmem:[#allocation7 + $0x258] sm:$0xff]  ;;  %v707_v1 = vld [vmem:[#allocation7 + $0x348] sm:$0xff] }
 0x117   :  { %v151_v13 = vmax.f32 %v147_v6, 0.0  ;;  %v600_v6 = vld [vmem:[#allocation7 + $0x250] sm:$0xff] }
 0x118   :  { %v150_v11 = vmax.f32 %v142_v10, 0.0  ;;  %v1428_v9 = vpack.c.bf16 %v601_v7, %v600_v6  ;;  %v603_v10 = vld [vmem:[#allocation7 + $0x268] sm:$0xff] }
 0x119   :  { %v787_v7 = vld [vmem:[#allocation7 + $0x368] sm:$0xff] }
 0x11a   :  { %1078 = vmatprep.mubr.f32.mxu1 %v150_v11  ;;  %v1431_v11 = vpack.c.bf16 %v603_v10, %v602_v8  ;;  %v789_v10 = vld [vmem:[#allocation7 + $0x378] sm:$0xff] }
 0x11b   :  { %1079 = vmatmul.mubr.f32.vlgmr.msra.gmra.mrb[0].mxu1 %v151_v13  ;;  %v605_v13 = vld [vmem:[#allocation7 + $0x278] sm:$0xff] }
 0x11c   :  { %1381 = vmatpush3.bf16.msra.mxu1 %v1380_v12  ;;  %1163 = vmatprep.mubr.msk.f32.mxu1 %vm1608_vm1, %v1609_v38  ;;  %v604_v12 = vld [vmem:[#allocation7 + $0x270] sm:$0xff] }
 0x11d   :  { %1382 = vmatprep.subr.bf16.mxu1 %v1607_v35  ;;  %v1434_v14 = vpack.c.bf16 %v605_v13, %v604_v12  ;;  %v791_v12 = vld [vmem:[#allocation7 + $0x388] sm:$0xff] }
 0x120   :  { %1384 = vmatpush3.bf16.msra.mxu1 %v1383_v16  ;;  %v330_v36 = vpop.f32.mrb[2].mxu0  ;;  %v607_v16 = vld [vmem:[#allocation7 + $0x288] sm:$0xff] }
 0x121   :  { %1385 = vmatprep.subr.bf16.mxu1 %v1607_v35  ;;  %v1095_v37 = vpop.f32.mrb[3].mxu0  ;;  %v331_v5 = vadd.f32 %v896_v3, %v330_v36  ;;  %v1437_v17 = vpack.c.bf16 %v607_v16, %v606_v15  ;;  %v784_v3 = vld [vmem:[#allocation7 + $0x350] sm:$0xff]  ;;  %v793_v15 = vld [vmem:[#allocation7 + $0x398] sm:$0xff] }
 0x122   :  { %v696_v37 = vld [vmem:[#allocation7 + $0x2f0] sm:$0xff] }
 0x123   :  { %v1458_v40 = vpack.c.bf16 %v697_v39, %v696_v37 }
 0x124   :  { %1387 = vmatpush3.bf16.msra.mxu1 %v1386_v19  ;;  %v609_v19 = vld [vmem:[#allocation7 + $0x298] sm:$0xff] }
 0x125   :  { %1388 = vmatprep.subr.bf16.mxu1 %v1607_v35  ;;  %v1440_v20 = vpack.c.bf16 %v609_v19, %v608_v18  ;;  %v795_v18 = vld [vmem:[#allocation7 + $0x3a8] sm:$0xff] }
 0x128   :  { %1390 = vmatpush3.bf16.msra.mxu1 %v1389_v22  ;;  %v611_v22 = vld [vmem:[#allocation7 + $0x2a8] sm:$0xff] }
 0x129   :  { %1391 = vmatprep.subr.bf16.mxu1 %v1607_v35  ;;  %v1443_v23 = vpack.c.bf16 %v611_v22, %v610_v21  ;;  %v797_v21 = vld [vmem:[#allocation7 + $0x3b8] sm:$0xff] }
 0x12c   :  { %1393 = vmatpush3.bf16.msra.mxu1 %v1392_v25  ;;  %v613_v25 = vld [vmem:[#allocation7 + $0x2b8] sm:$0xff] }
 0x12d   :  { %1394 = vmatprep.subr.bf16.mxu1 %v1607_v35  ;;  %v1446_v26 = vpack.c.bf16 %v613_v25, %v612_v24 }
 0x130   :  { %1396 = vmatpush3.bf16.msra.mxu1 %v1395_v28  ;;  %v615_v28 = vld [vmem:[#allocation7 + $0x2c8] sm:$0xff] }
 0x131   :  { %1397 = vmatprep.subr.bf16.mxu1 %v1607_v35  ;;  %v1449_v29 = vpack.c.bf16 %v615_v28, %v614_v27  ;;  %v798_v28 = vld [vmem:[#allocation7 + $0x3c0] sm:$0xff] }
 0x134   :  { %1399 = vmatpush3.bf16.msra.mxu1 %v1398_v31  ;;  %v693_v31 = vld [vmem:[#allocation7 + $0x2d8] sm:$0xff] }
 0x135   :  { %1400 = vmatprep.subr.bf16.mxu1 %v1607_v35  ;;  %v1452_v33 = vpack.c.bf16 %v693_v31, %v692_v30  ;;  %v900_v31 = vld [vmem:[%s1782_s3 + $0x5] ss:$0 sm:$0xff] }
 0x138   :  { %1402 = vmatpush3.bf16.msra.mxu1 %v1401_v34  ;;  %v695_v34 = vld [vmem:[#allocation7 + $0x2e8] sm:$0xff] }
 0x139   :  { %1427 = vmatprep.subr.bf16.mxu1 %v1607_v35  ;;  %v1455_v36 = vpack.c.bf16 %v695_v34, %v694_v32 }
 0x1ee   :  { %v1080_v42 = vpop.f32.mrb[0].mxu1 }
 0x1ef   :  { %v245_v44 = vadd.f32 %v1080_v42, %v895_v41  ;;  %v239_v45 = vpop.f32.mrb[1].mxu1  ;;  %v699_v42 = vld [vmem:[#allocation7 + $0x308] sm:$0xff] }
 0x1f0   :  { %v240_v48 = vadd.f32 %v895_v41, %v239_v45  ;;  %v698_v41 = vld [vmem:[#allocation7 + $0x300] sm:$0xff]  ;;  %v701_v45 = vld [vmem:[#allocation7 + $0x318] sm:$0xff] }
 0x1f1   :  { %1129 = vmatmul.mubr.f32.vlgmr.msra.gmra.mrb[4].mxu0 %v245_v44  ;;  %v700_v44 = vld [vmem:[#allocation7 + $0x310] sm:$0xff] }
 0x1f2   :  { %1405 = vmatpush3.bf16.msra.mxu0 %v1404_v43  ;;  %1164 = vmatmul.mubr.f32.vlgmr.msra.gmra.mrb[2].mxu1 %v240_v48  ;;  %v1461_v43 = vpack.c.bf16 %v699_v42, %v698_v41  ;;  %v1464_v46 = vpack.c.bf16 %v701_v45, %v700_v44  ;;  %v703_v48 = vld [vmem:[#allocation7 + $0x328] sm:$0xff] }
 0x1f3   :  { %1406 = vmatprep.subr.bf16.mxu0 %v1607_v35  ;;  %1198 = vmatprep.mubr.msk.f32.mxu0 %vm1608_vm1, %v1609_v38 }
 0x1f4   :  { %1233 = vmatprep.mubr.msk.f32.mxu1 %vm1608_vm1, %v1609_v38  ;;  %1429 = vmatpush3.bf16.msra.mxu1 %v1428_v9  ;;  %v788_v9 = vld [vmem:[#allocation7 + $0x370] sm:$0xff] }
 0x1f5   :  { %1430 = vmatprep.subr.bf16.mxu1 %v1607_v35 }
 0x1f6   :  { %1408 = vmatpush3.bf16.msra.mxu0 %v1407_v49  ;;  %v1467_v49 = vpack.c.bf16 %v703_v48, %v702_v47 }
 0x1f7   :  { %1409 = vmatprep.subr.bf16.mxu0 %v1607_v35 }
 0x1f8   :  { %1432 = vmatpush3.bf16.msra.mxu1 %v1431_v11  ;;  %v1482_v11 = vpack.c.bf16 %v789_v10, %v788_v9 }
 0x1f9   :  { %1433 = vmatprep.subr.bf16.mxu1 %v1607_v35 }
 0x1fa   :  { %1411 = vmatpush3.bf16.msra.mxu0 %v1410_v52  ;;  %v1470_v52 = vpack.c.bf16 %v705_v51, %v704_v50 }
 0x1fb   :  { %1412 = vmatprep.subr.bf16.mxu0 %v1607_v35 }
 0x1fc   :  { %1435 = vmatpush3.bf16.msra.mxu1 %v1434_v14  ;;  %v792_v14 = vld [vmem:[#allocation7 + $0x390] sm:$0xff] }
 0x1fd   :  { %1436 = vmatprep.subr.bf16.mxu1 %v1607_v35  ;;  %v1488_v16 = vpack.c.bf16 %v793_v15, %v792_v14 }
 0x1fe   :  { %1414 = vmatpush3.bf16.msra.mxu0 %v1413_v55 }
 0x1ff   :  { %1415 = vmatprep.subr.bf16.mxu0 %v1607_v35 }
 0x200   :  { %1438 = vmatpush3.bf16.msra.mxu1 %v1437_v17  ;;  %v794_v17 = vld [vmem:[#allocation7 + $0x3a0] sm:$0xff] }
 0x201   :  { %1439 = vmatprep.subr.bf16.mxu1 %v1607_v35  ;;  %v1491_v19 = vpack.c.bf16 %v795_v18, %v794_v17 }
 0x202   :  { %1417 = vmatpush3.bf16.msra.mxu0 %v1416_v58 }
 0x203   :  { %1418 = vmatprep.subr.bf16.mxu0 %v1607_v35 }
 0x204   :  { %1441 = vmatpush3.bf16.msra.mxu1 %v1440_v20  ;;  %v796_v20 = vld [vmem:[#allocation7 + $0x3b0] sm:$0xff] }
 0x205   :  { %1442 = vmatprep.subr.bf16.mxu1 %v1607_v35  ;;  %v1494_v22 = vpack.c.bf16 %v797_v21, %v796_v20 }
 0x206   :  { %1420 = vmatpush3.bf16.msra.mxu0 %v1419_v61 }
 0x207   :  { %1421 = vmatprep.subr.bf16.mxu0 %v1607_v35 }
 0x208   :  { %1444 = vmatpush3.bf16.msra.mxu1 %v1443_v23  ;;  %v899_v23 = vld [vmem:[%s1782_s3 + $0x4] ss:$0 sm:$0xff] }
 0x209   :  { %1445 = vmatprep.subr.bf16.mxu1 %v1607_v35 }
 0x20a   :  { %1423 = vmatpush3.bf16.msra.mxu0 %v1422_v0  ;;  %v706_v0 = vld [vmem:[#allocation7 + $0x340] sm:$0xff] }
 0x20b   :  { %1424 = vmatprep.subr.bf16.mxu0 %v1607_v35  ;;  %v1473_v2 = vpack.c.bf16 %v707_v1, %v706_v0 }
 0x20c   :  { %1447 = vmatpush3.bf16.msra.mxu1 %v1446_v26 }
 0x20d   :  { %1448 = vmatprep.subr.bf16.mxu1 %v1607_v35 }
 0x20e   :  { %1426 = vmatpush3.bf16.msra.mxu0 %v1425_v4  ;;  %v785_v4 = vld [vmem:[#allocation7 + $0x358] sm:$0xff] }
 0x20f   :  { %1451 = vmatprep.subr.bf16.mxu0 %v1607_v35  ;;  %v1476_v6 = vpack.c.bf16 %v785_v4, %v784_v3 }
 0x210   :  { %1450 = vmatpush3.bf16.msra.mxu1 %v1449_v29  ;;  %v799_v29 = vld [vmem:[#allocation7 + $0x3c8] sm:$0xff] }
 0x211   :  { %1199 = vmatmul.mubr.f32.vlgmr.msra.gmra.mrb[6].mxu0 %v331_v5  ;;  %1475 = vmatprep.subr.bf16.mxu1 %v1607_v35  ;;  %v786_v5 = vld [vmem:[#allocation7 + $0x360] sm:$0xff]  ;;  %v1497_v30 = vpack.c.bf16 %v799_v29, %v798_v28 }
 0x212   :  { %1268 = vmatprep.mubr.msk.f32.mxu0 %vm1608_vm1, %v1609_v38  ;;  %1453 = vmatpush3.bf16.msra.mxu0 %v1452_v33  ;;  %v1479_v8 = vpack.c.bf16 %v787_v7, %v786_v5 }
 0x213   :  { %1454 = vmatprep.subr.bf16.mxu0 %v1607_v35 }
 0x216   :  { %1456 = vmatpush3.bf16.msra.mxu0 %v1455_v36  ;;  %v901_v36 = vld [vmem:[%s1782_s3 + $0x6] ss:$0 sm:$0xff] }
 0x217   :  { %1457 = vmatprep.subr.bf16.mxu0 %v1607_v35 }
 0x21a   :  { %1459 = vmatpush3.bf16.msra.mxu0 %v1458_v40 }
 0x21b   :  { %1460 = vmatprep.subr.bf16.mxu0 %v1607_v35 }
 0x21e   :  { %1462 = vmatpush3.bf16.msra.mxu0 %v1461_v43 }
 0x21f   :  { %1463 = vmatprep.subr.bf16.mxu0 %v1607_v35 }
 0x222   :  { %1465 = vmatpush3.bf16.msra.mxu0 %v1464_v46 }
 0x223   :  { %1466 = vmatprep.subr.bf16.mxu0 %v1607_v35 }
 0x226   :  { %1468 = vmatpush3.bf16.msra.mxu0 %v1467_v49 }
 0x227   :  { %1469 = vmatprep.subr.bf16.mxu0 %v1607_v35 }
 0x22a   :  { %1471 = vmatpush3.bf16.msra.mxu0 %v1470_v52 }
 0x22b   :  { %1472 = vmatprep.subr.bf16.mxu0 %v1607_v35 }
 0x22e   :  { %1474 = vmatpush3.bf16.msra.mxu0 %v1473_v2 }
 0x2c4   :  { %v432_v53 = vpop.f32.mrb[4].mxu0 }
 0x2c5   :  { %v1130_v54 = vpop.f32.mrb[5].mxu0  ;;  %v502_v55 = vpop.f32.mrb[2].mxu1 }
 0x2c6   :  { %v503_v56 = vadd.f32 %v502_v55, %v432_v53  ;;  %v1165_v57 = vpop.f32.mrb[3].mxu1 }
 0x2e4   :  { %v588_v58 = vpop.f32.mrb[6].mxu0 }
 0x2e5   :  { %v592_v60 = vadd.f32 %v588_v58, %v503_v56  ;;  %v1200_v61 = vpop.f32.mrb[7].mxu0 }
 0x2e7   :  { %v598_v62 = vadd.f32 %v898_v59, %v592_v60 }
 0x2e9   :  { %v599_v63 = vmax.f32 %v598_v62, 0.0 }
 0x2eb   :  { %1234 = vmatmul.mubr.f32.vlgmr.msra.gmra.mrb[4].mxu1 %v599_v63 }
 0x2ec   :  { %1303 = vmatprep.mubr.msk.f32.mxu1 %vm1608_vm1, %v1609_v38  ;;  %1477 = vmatpush3.bf16.msra.mxu1 %v1476_v6  ;;  %v790_v38 = vld [vmem:[#allocation7 + $0x380] sm:$0xff] }
 0x2ed   :  { %1478 = vmatprep.subr.bf16.mxu1 %v1607_v35  ;;  %v1485_v13 = vpack.c.bf16 %v791_v12, %v790_v38 }
 0x2f0   :  { %1480 = vmatpush3.bf16.msra.mxu1 %v1479_v8 }
 0x2f1   :  { %1481 = vmatprep.subr.bf16.mxu1 %v1607_v35 }
 0x2f4   :  { %1483 = vmatpush3.bf16.msra.mxu1 %v1482_v11 }
 0x2f5   :  { %1484 = vmatprep.subr.bf16.mxu1 %v1607_v35 }
 0x2f8   :  { %1486 = vmatpush3.bf16.msra.mxu1 %v1485_v13 }
 0x2f9   :  { %1487 = vmatprep.subr.bf16.mxu1 %v1607_v35 }
 0x2fc   :  { %1489 = vmatpush3.bf16.msra.mxu1 %v1488_v16 }
 0x2fd   :  { %1490 = vmatprep.subr.bf16.mxu1 %v1607_v35 }
 0x300   :  { %1492 = vmatpush3.bf16.msra.mxu1 %v1491_v19 }
 0x301   :  { %1493 = vmatprep.subr.bf16.mxu1 %v1607_v35 }
 0x304   :  { %1495 = vmatpush3.bf16.msra.mxu1 %v1494_v22 }
 0x305   :  { %1496 = vmatprep.subr.bf16.mxu1 %v1607_v35 }
 0x308   :  { %1498 = vmatpush3.bf16.msra.mxu1 %v1497_v30 }
 0x3be   :  { %v687_v24 = vpop.f32.mrb[4].mxu1 }
 0x3bf   :  { %v688_v25 = vadd.f32 %v899_v23, %v687_v24  ;;  %v1235_v26 = vpop.f32.mrb[5].mxu1 }
 0x3c1   :  { %v691_v27 = vmax.f32 %v688_v25, 0.0 }
 0x3c3   :  { %1269 = vmatmul.mubr.f32.vlgmr.msra.gmra.mrb[8].mxu0 %v691_v27 }
 0x496   :  { %v779_v32 = vpop.f32.mrb[8].mxu0 }
 0x497   :  { %v780_v33 = vadd.f32 %v900_v31, %v779_v32  ;;  %v1270_v35 = vpop.f32.mrb[9].mxu0 }
 0x499   :  { %v783_v34 = vmax.f32 %v780_v33, 0.0 }
 0x49b   :  { %1304 = vmatmul.mubr.f32.vlgmr.msra.gmra.mrb[6].mxu1 %v783_v34 }
 0x56e   :  { %v871_v37 = vpop.f32.mrb[6].mxu1 }
 0x56f   :  { %v872_v39 = vadd.f32 %v901_v36, %v871_v37  ;;  %v1305_v40 = vpop.f32.mrb[7].mxu1 }
 0x571   :  { %875 = vst [vmem:[#allocation8] sm:$0xff] %v872_v39 }
 0x572   :  { %1585 = shalt.err (!%p1582_p0)
}
 0x573   :  { %s1586_s16 = scalar_lea.hbm %s1783_s4, 128 }
 0x574   :  { %p1587_p1 = scmp.ne.s32.totalorder %s1783_s4, %s1586_s16  ;;  %p1590_p2 = scmp.lt.u32.totalorder %s1586_s16, %s1783_s4 }
 0x576   :  { %p1592_p3 = pnand %p1590_p2, %p1587_p1 }
 0x578   :  { %1595 = shalt.err (!%p1592_p3)
}
 0x579   :  { %885 = dma.vmem_to_hbm [thread:$0]  %s883_s12, 128, %s1783_s4, [#allocation4]  }
 0x57a   :  { %1600 = dma.done.wait [#allocation4], 128  }
 0x57b   :  { %1601 = vsyncadd [#allocation4], 4294967168 }
 0x57c   :  { %889 = vsyncpa [#allocation3], 1 }
 0x57d   :  { %890 = vsyncpa [#allocation6], 1 }
 0x57e   :  { %891 = vsyncpa [#allocation4], 1 }

</bundles_post_ra>
